<compile_context>
chip_gen: v7x
topology: tpu7x:2x2x1
jax: 0.10.0
libtpu: 0.0.40
codegen_flags: <defaults>
</compile_context>

<pallas_src>
import jax
import jax.numpy as jnp
from jax.experimental import pallas as pl
from jax.experimental.pallas import tpu as pltpu


# Below this batch size a single no-grid call beats any tiling/megacore gain
# (per-step compute is four tiny matmuls; pipeline overhead would dominate).
_SINGLE_BLOCK_MAX = 1024


def _round_up(x, m):
    return (x + m - 1) // m * m


def _make_actor_sac_kernel(matmul_dtype):
    """Build the fused ActorSAC.forward kernel.

    matmul_dtype: None -> feed the MXU whatever dtype the operands are in;
                  jnp.bfloat16 -> cast only the dot operands (native MXU dtype on
                  v5e/v6e/v7x). Accumulation is always f32.
    """

    def mm(a, w_ref):
        w = w_ref[...]
        if matmul_dtype is not None:
            a = a.astype(matmul_dtype)
            w = w.astype(matmul_dtype)
        return jnp.dot(a, w, preferred_element_type=jnp.float32)

    def kernel(x_ref,
               w1_ref, b1_ref,
               w2_ref, b2_ref,
               w3_ref, b3_ref,
               w4_ref, b4_ref,
               o_ref):
        # Hoist bias reads once (JAX does not CSE broadcast_in_dim).
        b1 = b1_ref[...].astype(jnp.float32)
        b2 = b2_ref[...].astype(jnp.float32)
        b3 = b3_ref[...].astype(jnp.float32)
        b4 = b4_ref[...].astype(jnp.float32)

        # net_state: Linear -> ReLU -> Linear -> ReLU
        h = jnp.maximum(mm(x_ref[...], w1_ref) + b1, 0.0)
        h = jnp.maximum(mm(h, w2_ref) + b2, 0.0)

        # net_a_avg: Linear -> Hardswish -> Linear, then .tanh()
        h = mm(h, w3_ref) + b3
        h = h * jnp.clip(h + 3.0, 0.0, 6.0) * (1.0 / 6.0)        # Hardswish
        out = mm(h, w4_ref) + b4
        o_ref[...] = jnp.tanh(out).astype(o_ref.dtype)

    return kernel


def _cost_estimate(state, weights, batch, state_dim, mid_dim, action_dim):
    flops = 2 * batch * (state_dim * mid_dim
                         + mid_dim * mid_dim
                         + mid_dim * mid_dim
                         + mid_dim * action_dim)
    transcendentals = batch * action_dim  # tanh head (EUP)
    bytes_accessed = (state.size * state.dtype.itemsize
                      + sum(w.size * w.dtype.itemsize for w in weights)
                      + batch * action_dim * 4)  # f32 output
    return pl.CostEstimate(flops=flops,
                           transcendentals=transcendentals,
                           bytes_accessed=bytes_accessed)


def actor_sac_forward(state, params, *, block_m=4096, matmul_dtype=None):
    """ActorSAC.forward.

    state : (batch, state_dim) array (f32; may be bf16 on v6e/v7x to halve x DMA)
    params: dict with w1..w4 of shape (in, out) and b1..b4 of shape (1, out)
            (store weights in bf16 + pass matmul_dtype=jnp.bfloat16 on v6e/v7x)
    returns (batch, action_dim) float32
    """
    batch, state_dim = state.shape
    mid_dim = params["w1"].shape[1]
    action_dim = params["w4"].shape[1]

    weights = (params["w1"], params["b1"],
               params["w2"], params["b2"],
               params["w3"], params["b3"],
               params["w4"], params["b4"])

    kernel = _make_actor_sac_kernel(matmul_dtype)
    cost = _cost_estimate(state, weights, batch, state_dim, mid_dim, action_dim)
    out_shape = jax.ShapeDtypeStruct((batch, action_dim), jnp.float32)

    if batch <= min(block_m, _SINGLE_BLOCK_MAX):
        # Small batch: single invocation, no grid, whole-array VMEM blocks.
        return pl.pallas_call(
            kernel,
            out_shape=out_shape,
            in_specs=[pl.BlockSpec(memory_space=pltpu.VMEM)
                      for _ in range(1 + len(weights))],
            out_specs=pl.BlockSpec(memory_space=pltpu.VMEM),
            cost_estimate=cost,
        )(state, *weights)

    # Large batch: tile the batch axis. Clamp tm so there are always >= 2
    # (balanced) blocks -> both v7x TensorCores get work; no-op on v5e/v6e.
    tm = min(block_m, _round_up(pl.cdiv(batch, 2), 8))
    num_blocks = pl.cdiv(batch, tm)

    in_specs = [
        # x: batch-tiled, triple-buffered so its DMA hides behind the tiny compute.
        pl.BlockSpec((tm, state_dim), lambda i: (i, 0),
                     pipeline_mode=pl.Buffered(3)),
        pl.BlockSpec((state_dim, mid_dim), lambda i: (0, 0)),   # w1 (resident)
        pl.BlockSpec((1, mid_dim), lambda i: (0, 0)),           # b1
        pl.BlockSpec((mid_dim, mid_dim), lambda i: (0, 0)),     # w2
        pl.BlockSpec((1, mid_dim), lambda i: (0, 0)),           # b2
        pl.BlockSpec((mid_dim, mid_dim), lambda i: (0, 0)),     # w3
        pl.BlockSpec((1, mid_dim), lambda i: (0, 0)),           # b3
        pl.BlockSpec((mid_dim, action_dim), lambda i: (0, 0)),  # w4
        pl.BlockSpec((1, action_dim), lambda i: (0, 0)),        # b4
    ]

    # No pad / slice: out_shape is exactly (batch, action_dim); Pallas masks the
    # ragged last block's stores (rows are independent, OOB rows never written).
    return pl.pallas_call(
        kernel,
        out_shape=out_shape,
        grid=(num_blocks,),
        in_specs=in_specs,
        out_specs=pl.BlockSpec((tm, action_dim), lambda i: (i, 0)),
        compiler_params=pltpu.CompilerParams(
            dimension_semantics=("parallel",)),
        cost_estimate=cost,
    )(state, *weights)


def init_actor_sac_params(key, mid_dim, state_dim, action_dim,
                          dtype=jnp.float32):
    """PyTorch-Linear-style uniform init.

    Weights are stored as (in_features, out_features) -- transposed vs. torch's
    (out, in) -- so the kernel computes x @ W directly. Use dtype=jnp.bfloat16
    (plus matmul_dtype=jnp.bfloat16) on v6e/v7x to halve weight DMA and hit the
    native MXU dtype.
    """
    dims = [(state_dim, mid_dim), (mid_dim, mid_dim),
            (mid_dim, mid_dim), (mid_dim, action_dim)]
    params = {}
    for i, (fan_in, fan_out) in enumerate(dims, start=1):
        key, kw, kb = jax.random.split(key, 3)
        bound = 1.0 / (fan_in ** 0.5)
        params[f"w{i}"] = jax.random.uniform(
            kw, (fan_in, fan_out), jnp.float32,
            minval=-bound, maxval=bound).astype(dtype)
        params[f"b{i}"] = jax.random.uniform(
            kb, (1, fan_out), jnp.float32,
            minval=-bound, maxval=bound).astype(dtype)
    return params


def actor_sac_reference(state, params):
    """Plain-JAX reference of ActorSAC.forward."""
    h = jnp.maximum(state @ params["w1"] + params["b1"], 0.0)
    h = jnp.maximum(h @ params["w2"] + params["b2"], 0.0)
    h = h @ params["w3"] + params["b3"]
    h = h * jnp.clip(h + 3.0, 0.0, 6.0) / 6.0                   # Hardswish
    return jnp.tanh(h @ params["w4"] + params["b4"])


if __name__ == "__main__":
    # TODO(synk): for real SAC nets, size mid_dim/action_dim toward multiples of
    # 128 -- lane-sparse 32/4-wide layers waste vregs and MXU columns; left as-is
    # here to match the reference module (do NOT pad the HBM output just to get
    # unmasked stores -- that would multiply output write traffic).
    state_dim = 16
    mid_dim = 32
    action_dim = 4

    key = jax.random.PRNGKey(0)
    key, k_small, k_large = jax.random.split(key, 3)
    params = init_actor_sac_params(key, mid_dim, state_dim, action_dim)

    # 1) Small batch -> single no-grid fused call (f32 MXU operands).
    state_small = jax.random.normal(k_small, (8, state_dim), jnp.float32)
    out_small = jax.block_until_ready(actor_sac_forward(state_small, params))
    ref_small = actor_sac_reference(state_small, params)
    assert out_small.shape == (8, action_dim)
    assert jnp.allclose(out_small, ref_small, atol=1e-4, rtol=1e-4), \
        "small-batch mismatch vs reference"

    # 2) Larger, non-multiple batch with a small block_m to exercise the tiled
    #    'parallel' grid path + ragged (masked) last block, no pad/slice copies.
    state_large = jax.random.normal(k_large, (272, state_dim), jnp.float32)
    out_large = jax.block_until_ready(
        actor_sac_forward(state_large, params, block_m=128))
    ref_large = actor_sac_reference(state_large, params)
    assert out_large.shape == (272, action_dim)
    assert jnp.allclose(out_large, ref_large, atol=1e-4, rtol=1e-4), \
        "tiled-batch mismatch vs reference"

    # 3) Same tiled path with bf16 MXU operands (native MXU dtype on v5e/v6e/v7x);
    #    looser tolerance for the reduced mantissa.
    out_bf16 = jax.block_until_ready(
        actor_sac_forward(state_large, params, block_m=128,
                          matmul_dtype=jnp.bfloat16))
    assert out_bf16.shape == (272, action_dim)
    assert jnp.allclose(out_bf16, ref_large, atol=3e-2, rtol=3e-2), \
        "bf16-matmul mismatch vs reference"

    print("KERNEL_OK")
</pallas_src>

<mosaic_0001>
module attributes {stable_mosaic.version = 11 : i64} {
  func.func @kernel(%arg0: memref<8x16xf32, #tpu.memory_space<vmem>>, %arg1: memref<16x32xf32, #tpu.memory_space<vmem>>, %arg2: memref<1x32xf32, #tpu.memory_space<vmem>>, %arg3: memref<32x32xf32, #tpu.memory_space<vmem>>, %arg4: memref<1x32xf32, #tpu.memory_space<vmem>>, %arg5: memref<32x32xf32, #tpu.memory_space<vmem>>, %arg6: memref<1x32xf32, #tpu.memory_space<vmem>>, %arg7: memref<32x4xf32, #tpu.memory_space<vmem>>, %arg8: memref<1x4xf32, #tpu.memory_space<vmem>>, %arg9: memref<8x4xf32, #tpu.memory_space<vmem>>) attributes {dimension_semantics = [], scalar_prefetch = 0 : i64, scratch_operands = 0 : i64, tpu.core_type = #tpu.core_type<tc>} {
    %c0 = arith.constant 0 : index
    %c0_0 = arith.constant 0 : index
    %0 = vector.load %arg2[%c0, %c0_0] : memref<1x32xf32, #tpu.memory_space<vmem>>, vector<1x32xf32>
    %c0_1 = arith.constant 0 : index
    %c0_2 = arith.constant 0 : index
    %1 = vector.load %arg4[%c0_1, %c0_2] : memref<1x32xf32, #tpu.memory_space<vmem>>, vector<1x32xf32>
    %c0_3 = arith.constant 0 : index
    %c0_4 = arith.constant 0 : index
    %2 = vector.load %arg6[%c0_3, %c0_4] : memref<1x32xf32, #tpu.memory_space<vmem>>, vector<1x32xf32>
    %c0_5 = arith.constant 0 : index
    %c0_6 = arith.constant 0 : index
    %3 = vector.load %arg8[%c0_5, %c0_6] : memref<1x4xf32, #tpu.memory_space<vmem>>, vector<1x4xf32>
    %c0_7 = arith.constant 0 : index
    %c0_8 = arith.constant 0 : index
    %4 = vector.load %arg0[%c0_7, %c0_8] : memref<8x16xf32, #tpu.memory_space<vmem>>, vector<8x16xf32>
    %c0_9 = arith.constant 0 : index
    %c0_10 = arith.constant 0 : index
    %5 = vector.load %arg1[%c0_9, %c0_10] : memref<16x32xf32, #tpu.memory_space<vmem>>, vector<16x32xf32>
    %cst = arith.constant dense<0.000000e+00> : vector<8x32xf32>
    %6 = tpu.matmul %4, %5, %cst {dimension_numbers = #tpu.dot_dimension_numbers<[1], [0], [0], [1], [0, 0, 1, 1], [], []>} : vector<8x16xf32>, vector<16x32xf32>, vector<8x32xf32> -> vector<8x32xf32>
    %7 = vector.broadcast %0 : vector<1x32xf32> to vector<8x32xf32>
    %8 = arith.addf %6, %7 : vector<8x32xf32>
    %cst_11 = arith.constant 0.000000e+00 : f32
    %9 = vector.broadcast %cst_11 : f32 to vector<8x32xf32>
    %10 = arith.maximumf %8, %9 : vector<8x32xf32>
    %c0_12 = arith.constant 0 : index
    %c0_13 = arith.constant 0 : index
    %11 = vector.load %arg3[%c0_12, %c0_13] : memref<32x32xf32, #tpu.memory_space<vmem>>, vector<32x32xf32>
    %cst_14 = arith.constant dense<0.000000e+00> : vector<8x32xf32>
    %12 = tpu.matmul %10, %11, %cst_14 {dimension_numbers = #tpu.dot_dimension_numbers<[1], [0], [0], [1], [0, 0, 1, 1], [], []>} : vector<8x32xf32>, vector<32x32xf32>, vector<8x32xf32> -> vector<8x32xf32>
    %13 = vector.broadcast %1 : vector<1x32xf32> to vector<8x32xf32>
    %14 = arith.addf %12, %13 : vector<8x32xf32>
    %cst_15 = arith.constant 0.000000e+00 : f32
    %15 = vector.broadcast %cst_15 : f32 to vector<8x32xf32>
    %16 = arith.maximumf %14, %15 : vector<8x32xf32>
    %c0_16 = arith.constant 0 : index
    %c0_17 = arith.constant 0 : index
    %17 = vector.load %arg5[%c0_16, %c0_17] : memref<32x32xf32, #tpu.memory_space<vmem>>, vector<32x32xf32>
    %cst_18 = arith.constant dense<0.000000e+00> : vector<8x32xf32>
    %18 = tpu.matmul %16, %17, %cst_18 {dimension_numbers = #tpu.dot_dimension_numbers<[1], [0], [0], [1], [0, 0, 1, 1], [], []>} : vector<8x32xf32>, vector<32x32xf32>, vector<8x32xf32> -> vector<8x32xf32>
    %19 = vector.broadcast %2 : vector<1x32xf32> to vector<8x32xf32>
    %20 = arith.addf %18, %19 : vector<8x32xf32>
    %cst_19 = arith.constant 3.000000e+00 : f32
    %21 = vector.broadcast %cst_19 : f32 to vector<8x32xf32>
    %22 = arith.addf %20, %21 : vector<8x32xf32>
    %cst_20 = arith.constant 0.000000e+00 : f32
    %cst_21 = arith.constant 6.000000e+00 : f32
    %23 = vector.broadcast %cst_20 : f32 to vector<8x32xf32>
    %24 = arith.maximumf %23, %22 : vector<8x32xf32>
    %25 = vector.broadcast %cst_21 : f32 to vector<8x32xf32>
    %26 = arith.minimumf %25, %24 : vector<8x32xf32>
    %27 = arith.mulf %20, %26 : vector<8x32xf32>
    %cst_22 = arith.constant 0.166666672 : f32
    %28 = vector.broadcast %cst_22 : f32 to vector<8x32xf32>
    %29 = arith.mulf %27, %28 : vector<8x32xf32>
    %c0_23 = arith.constant 0 : index
    %c0_24 = arith.constant 0 : index
    %30 = vector.load %arg7[%c0_23, %c0_24] : memref<32x4xf32, #tpu.memory_space<vmem>>, vector<32x4xf32>
    %cst_25 = arith.constant dense<0.000000e+00> : vector<8x4xf32>
    %31 = tpu.matmul %29, %30, %cst_25 {dimension_numbers = #tpu.dot_dimension_numbers<[1], [0], [0], [1], [0, 0, 1, 1], [], []>} : vector<8x32xf32>, vector<32x4xf32>, vector<8x4xf32> -> vector<8x4xf32>
    %32 = vector.broadcast %3 : vector<1x4xf32> to vector<8x4xf32>
    %33 = arith.addf %31, %32 : vector<8x4xf32>
    %34 = math.tanh %33 : vector<8x4xf32>
    %c0_26 = arith.constant 0 : index
    %c0_27 = arith.constant 0 : index
    %35 = vector.load %arg9[%c0_26, %c0_27] : memref<8x4xf32, #tpu.memory_space<vmem>>, vector<8x4xf32>
    tpu.vector_store %arg9[%c0_26, %c0_27], %34 {strides = array<i32>} : memref<8x4xf32, #tpu.memory_space<vmem>>, vector<8x4xf32>,
    return
  }
}

</mosaic_0001>

<bundles_post_ra>
// kernel: tpu_custom_call.1
= control target key start
LH: loop header
LB: loop body
LE: loop exit
PB: predicated region body
PF: predicated region fallthrough
CT: control target
= control target key end

     0   :  { %14 = vsyncpa [#allocation3], 0  ;;  %s687_s0 = inlined_call_operand.vmem [shape: f32[8,16], index: 0, kind: input, shape index: {}]   ;;  %s688_s1 = inlined_call_operand.hbm [shape: f32[16,32], index: 1, kind: input, shape index: {}]   ;;  %s689_s2 = inlined_call_operand.vmem [shape: f32[1,32], index: 2, kind: input, shape index: {}]   ;;  %s690_s3 = inlined_call_operand.vmem [shape: f32[32,32], index: 3, kind: input, shape index: {}]   ;;  %s691_s4 = inlined_call_operand.vmem [shape: f32[1,32], index: 4, kind: input, shape index: {}]   ;;  %s692_s5 = inlined_call_operand.hbm [shape: f32[32,32], index: 5, kind: input, shape index: {}]   ;;  %s693_s6 = inlined_call_operand.vmem [shape: f32[1,32], index: 6, kind: input, shape index: {}]   ;;  %s694_s7 = inlined_call_operand.vmem [shape: f32[32,4], index: 7, kind: input, shape index: {}]   ;;  %s695_s8 = inlined_call_operand.vmem [shape: f32[1,4], index: 8, kind: input, shape index: {}]   ;;  %s696_s9 = inlined_call_operand.vmem [shape: f32[8,4], index: 9, kind: output, shape index: {}]  }
   0x1   :  { %15 = vsyncpa [#allocation5], 0  ;;  %s557_s30 = smov [#allocation2]   ;;  %s509_s13 = scalar_lea.hbm %s688_s1, 256 }
   0x2   :  { %s23_s10 = sshll.u32 %s557_s30, 4  ;;  %p510_p0 = scmp.ne.s32.totalorder %s688_s1, %s509_s13  ;;  %s24_s10 = int_to_ptr.vmem [resolvable:$true] %s23_s10 }
   0x3   :  { %p513_p1 = scmp.lt.u32.totalorder %s509_s13, %s688_s1 }
   0x5   :  { %p515_p2 = pnand %p513_p1, %p510_p0 }
   0x7   :  { %518 = shalt.err (!%p515_p2)
}
   0x8   :  { %s519_s18 = scalar_lea.vmem %s24_s10, 256  ;;  %p524_p4 = scmp.lt.s32.totalorder %s24_s10, %s24_s10 }
   0x9   :  { %p520_p3 = scmp.ne.s32.totalorder %s24_s10, %s519_s18  ;;  %p525_p5 = scmp.lt.s32.totalorder %s519_s18, %s519_s18 }
   0xb   :  { %p526_p6 = por %p525_p5, %p524_p4 }
   0xd   :  { %p527_p7 = pnand %p526_p6, %p520_p3 }
   0xf   :  { %530 = shalt.err (!%p527_p7)
}
  0x10   :  { %s558_s19 = smov 128   ;;  %s559_s20 = smov 8  }
  0x11   :  { %29 = dma.hbm_to_vmem [thread:$0]  %s688_s1, 256, %s24_s10, [#allocation3], %s558_s19, %s558_s19, %s559_s20  }
  0x12   :  { %s560_s23 = smov [#allocation4]   ;;  %s531_s27 = scalar_lea.hbm %s692_s5, 512 }
  0x13   :  { %s41_s24 = sshll.u32 %s560_s23, 4  ;;  %p532_p8 = scmp.ne.s32.totalorder %s692_s5, %s531_s27  ;;  %s42_s24 = int_to_ptr.vmem [resolvable:$true] %s41_s24 }
  0x14   :  { %p535_p9 = scmp.lt.u32.totalorder %s531_s27, %s692_s5 }
  0x16   :  { %p537_p10 = pnand %p535_p9, %p532_p8 }
  0x18   :  { %540 = shalt.err (!%p537_p10)
}
  0x19   :  { %s541_s12 = scalar_lea.vmem %s42_s24, 512  ;;  %p546_p12 = scmp.lt.s32.totalorder %s42_s24, %s42_s24 }
  0x1a   :  { %p542_p11 = scmp.ne.s32.totalorder %s42_s24, %s541_s12  ;;  %p547_p13 = scmp.lt.s32.totalorder %s541_s12, %s541_s12 }
  0x1c   :  { %p548_p0 = por %p547_p13, %p546_p12 }
  0x1e   :  { %p549_p1 = pnand %p548_p0, %p542_p11 }
  0x20   :  { %552 = shalt.err (!%p549_p1)
}
  0x21   :  { %47 = dma.hbm_to_vmem [thread:$0]  %s692_s5, 512, %s42_s24, [#allocation5], %s558_s19, %s558_s19, %s559_s20  }
  0x22   :  { %553 = dma.done.wait [#allocation3], 256  }
  0x23   :  { %554 = vsyncadd [#allocation3], 4294967040 }
  0x24   :  { %555 = dma.done.wait [#allocation5], 512  }
  0x25   :  { %556 = vsyncadd [#allocation5], 4294966784  ;;  %v561_v0 = vmov 0.0|0.0   ;;  %vm562_vm0 = vmmov 0   ;;  %v563_v1 = vmov 0.0   ;;  %v65_v2 = vld [vmem:[#allocation2] sm:$0xff] }
  0x26   :  { %479 = vmatprep.subr.bf16.mxu0 %v561_v0  ;;  %443 = vmatprep.mubr.msk.f32.mxu0 %vm562_vm0, %v563_v1  ;;  %v66_v3 = vld [vmem:[#allocation2 + $0x8] sm:$0xff]  ;;  %v148_v5 = vld [vmem:[%s690_s3] sm:$0xff]  ;;  %vm73_vm1 = vcmask 130048   ;;  %v150_v9 = vld [vmem:[%s690_s3 + $0x10] sm:$0xff]  ;;  %vm158_vm2 = vcmask 261120   ;;  %vm405_vm3 = vcmask 31744  }
  0x27   :  { %482 = vmatprep.subr.bf16.mxu1 %v561_v0  ;;  %454 = vmatprep.mubr.msk.f32.mxu1 %vm562_vm0, %v563_v1  ;;  %v480_v4 = vpack.c.bf16 %v66_v3, %v65_v2  ;;  %v149_v6 = vld [vmem:[%s690_s3 + $0x8] sm:$0xff]  ;;  %v64_v8 = vld [vmem:[%s687_s0] sm:$0xff]  ;;  %v151_v10 = vld [vmem:[%s690_s3 + $0x18] sm:$0xff] }
  0x28   :  { %v483_v7 = vpack.c.bf16 %v149_v6, %v148_v5  ;;  %v486_v11 = vpack.c.bf16 %v151_v10, %v150_v9  ;;  %v233_v12 = vld [vmem:[#allocation4] sm:$0xff]  ;;  %v234_v13 = vld [vmem:[#allocation4 + $0x8] sm:$0xff]  ;;  %v413_v15 = vld [vmem:[%s689_s2] ss:$0 sm:$0xff] }
  0x29   :  { %481 = vmatpush3.bf16.msra.mxu0 %v480_v4  ;;  %v489_v14 = vpack.c.bf16 %v234_v13, %v233_v12  ;;  %v235_v20 = vld [vmem:[#allocation4 + $0x10] sm:$0xff]  ;;  %v236_v21 = vld [vmem:[#allocation4 + $0x18] sm:$0xff]  ;;  %v323_v31 = vld [vmem:[%s694_s7 + $0x10] sm:$0xff] }
  0x2a   :  { %484 = vmatpush3.bf16.msra.mxu1 %v483_v7  ;;  %488 = vmatprep.subr.bf16.mxu0 %v561_v0  ;;  %v492_v22 = vpack.c.bf16 %v236_v21, %v235_v20  ;;  %v415_v23 = vld [vmem:[%s691_s4] ss:$0 sm:$0xff]  ;;  %v322_v29 = vld [vmem:[%s694_s7 + $0x8] sm:$0xff]  ;;  %v324_v32 = vld [vmem:[%s694_s7 + $0x18] sm:$0xff] }
  0x2b   :  { %485 = vmatprep.subr.bf16.mxu1 %v561_v0  ;;  %v321_v28 = vld [vmem:[%s694_s7] sm:$0xff]  ;;  %v498_v33 = vpack.c.bf16 %v324_v32, %v323_v31 }
  0x2c   :  { %444 = vmatmul.mubr.msk.f32.vlgmr.msra.gmra.mrb[0].mxu0 %vm73_vm1, %v64_v8  ;;  %v495_v30 = vpack.c.bf16 %v322_v29, %v321_v28  ;;  %v417_v34 = vld [vmem:[%s693_s6] ss:$0 sm:$0xff] }
  0x2d   :  { %465 = vmatprep.mubr.msk.f32.mxu0 %vm562_vm0, %v563_v1  ;;  %490 = vmatpush3.bf16.msra.mxu0 %v489_v14  ;;  %v419_v43 = vld [vmem:[%s695_s8] ss:$0 sm:$0xff] }
  0x2e   :  { %487 = vmatpush3.bf16.msra.mxu1 %v486_v11  ;;  %491 = vmatprep.subr.bf16.mxu0 %v561_v0 }
  0x2f   :  { %494 = vmatprep.subr.bf16.mxu1 %v561_v0 }
  0x31   :  { %493 = vmatpush3.bf16.msra.mxu0 %v492_v22 }
  0xff   :  { %v143_v16 = vpop.f32.mrb[0].mxu0 }
 0x100   :  { %v144_v17 = vadd.f32 %v413_v15, %v143_v16  ;;  %v445_v18 = vpop.f32.mrb[1].mxu0 }
 0x102   :  { %v147_v19 = vmax.f32 %v144_v17, 0.0 }
 0x104   :  { %455 = vmatmul.mubr.msk.f32.vlgmr.msra.gmra.mrb[0].mxu1 %vm158_vm2, %v147_v19 }
 0x105   :  { %476 = vmatprep.mubr.msk.f32.mxu1 %vm562_vm0, %v563_v1  ;;  %496 = vmatpush3.bf16.msra.mxu1 %v495_v30 }
 0x106   :  { %497 = vmatprep.subr.bf16.mxu1 %v561_v0 }
 0x109   :  { %499 = vmatpush3.bf16.msra.mxu1 %v498_v33 }
 0x1d7   :  { %v228_v24 = vpop.f32.mrb[0].mxu1 }
 0x1d8   :  { %v229_v25 = vadd.f32 %v415_v23, %v228_v24  ;;  %v456_v26 = vpop.f32.mrb[1].mxu1 }
 0x1da   :  { %v232_v27 = vmax.f32 %v229_v25, 0.0 }
 0x1dc   :  { %466 = vmatmul.mubr.msk.f32.vlgmr.msra.gmra.mrb[2].mxu0 %vm158_vm2, %v232_v27 }
 0x2af   :  { %v312_v35 = vpop.f32.mrb[2].mxu0 }
 0x2b0   :  { %v313_v36 = vadd.f32 %v417_v34, %v312_v35  ;;  %v467_v37 = vpop.f32.mrb[3].mxu0 }
 0x2b2   :  { %v316_v38 = vadd.f32 3.0, %v313_v36 }
 0x2b4   :  { %v317_v39 = vmax.f32 %v316_v38, 0.0 }
 0x2b6   :  { %v318_v40 = vmin.f32 %v317_v39, 6.0 }
 0x2b8   :  { %v319_v41 = vmul.f32 %v318_v40, %v313_v36 }
 0x2ba   :  { %v320_v42 = vmul.f32 0.16666667, %v319_v41 }
 0x2bc   :  { %477 = vmatmul.mubr.msk.f32.vlgmr.msra.gmra.mrb[2].mxu1 %vm158_vm2, %v320_v42 }
 0x38f   :  { %v400_v44 = vpop.f32.mrb[2].mxu1 }
 0x390   :  { %v401_v45 = vadd.f32 %v419_v43, %v400_v44  ;;  %v478_v46 = vpop.f32.mrb[3].mxu1 }
 0x392   :  { %507 = vtanh.f32 %v401_v45 }
 0x39c   :  { %v508_v47 = vpop.eup %507 }
 0x39d   :  { %406 = vst.msk [vmem:[%s696_s9] sm:$0xff] %vm405_vm3, %v508_v47 }
 0x39e   :  { %411 = vsyncpa [#allocation3], 1 }
 0x39f   :  { %412 = vsyncpa [#allocation5], 1 }

</bundles_post_ra>
